<compile_context>
chip_gen: v5e
topology: v5e:2x2
jax: 0.10.0
libtpu: 0.0.40
codegen_flags: <defaults>
</compile_context>

<pallas_src>
import jax
import jax.numpy as jnp
from jax.experimental import pallas as pl
from jax.experimental.pallas import tpu as pltpu


def _sigmoid(z):
    # exp and reciprocal both issue on the EUP slot (free relative to VPU/MXU work).
    return pl.reciprocal(1.0 + jnp.exp(-z), approx=True)


def mlp_kernel(x_ref, w1_ref, b1_ref, w2_ref, b2_ref, w3_ref, b3_ref, o_ref):
    cd = w1_ref.dtype                      # MXU operand dtype (f32 or bf16)
    x = x_ref[...].astype(cd)              # in-kernel cast: x's HBM stream stays f32

    # fc1: h1^T = W1 (H,F) . x^T  -> (H, tile_b); contraction of both minor dims (A @ B^T),
    # batch lands on the lane axis.
    h1 = jax.lax.dot_general(
        w1_ref[...], x,
        dimension_numbers=(((1,), (1,)), ((), ())),
        preferred_element_type=jnp.float32)
    h1 = _sigmoid(h1 + b1_ref[...])        # b1 (H,1) broadcasts across lanes; f32 math

    # fc2: h2^T = W2 (E,H) @ h1^T (H, tile_b) -> (E, tile_b)
    h2 = jnp.dot(w2_ref[...], h1.astype(cd), preferred_element_type=jnp.float32)
    h2 = _sigmoid(h2 + b2_ref[...])

    # fc_last: out = W3 (1,E) @ h2^T (E, tile_b) -> (1, tile_b), already lane-dense.
    out = jnp.dot(w3_ref[...], h2.astype(cd), preferred_element_type=jnp.float32)
    o_ref[...] = (out + b3_ref[...]).astype(o_ref.dtype)


def _pick_tile_b(B, requested):
    """Multiple of 128 (batch lives on lanes), >= 2 grid steps when B allows (v7x has
    2 TensorCores), and dividing B exactly when possible (no wrapper-side pad copy)."""
    t = max(128, (min(requested, B) // 128) * 128)
    if B >= 256 and t > B // 2:
        t = max(128, ((B // 2) // 128) * 128)
    while t > 128 and B % t != 0:
        t -= 128
    return t


def mlp_forward(x, params, *, tile_b=2048, compute_dtype=None):
    """x: (B, feature_dim) float32 -> (B, 1) float32.

    compute_dtype: None -> f32 MXU operands; jnp.bfloat16 -> bf16 MXU operands (x cast
    inside the kernel, weights pre-cast).  Bias-add and sigmoid are always done in f32.
    """
    w1, b1, w2, b2, w3, b3 = params
    B, F = x.shape
    H = w1.shape[0]          # embed_dim * 2
    E = w2.shape[0]          # embed_dim

    if compute_dtype is not None:
        # Weights are tiny (casting them once is negligible); x stays f32 in HBM and is
        # cast inside the kernel so no extra pass over the dominant stream is added.
        w1 = w1.astype(compute_dtype)
        w2 = w2.astype(compute_dtype)
        w3 = w3.astype(compute_dtype)

    tile_b = _pick_tile_b(B, tile_b)
    num_tiles = pl.cdiv(B, tile_b)
    B_pad = num_tiles * tile_b
    if B_pad != B:
        # Fallback only when B is not a multiple of 128; _pick_tile_b avoids it otherwise.
        x = jnp.pad(x, ((0, B_pad - B), (0, 0)))

    itemsize = jnp.dtype(x.dtype).itemsize
    w_itemsize = jnp.dtype(w1.dtype).itemsize
    cost = pl.CostEstimate(
        flops=2 * B_pad * (F * H + H * E + E),
        transcendentals=2 * B_pad * (H + E),            # exp + reciprocal per activation
        bytes_accessed=(B_pad * F * itemsize            # x in
                        + B_pad * 4                     # out
                        + (F * H + H * E + E) * w_itemsize
                        + (H + E + 1) * 4))             # biases

    out_row = pl.pallas_call(
        mlp_kernel,
        # Lane-dense (1, B_pad) output slab; each grid step writes one (1, tile_b) chunk.
        out_shape=jax.ShapeDtypeStruct((1, B_pad), jnp.float32),
        grid_spec=pltpu.PrefetchScalarGridSpec(
            num_scalar_prefetch=0,
            grid=(num_tiles,),
            in_specs=[
                pl.BlockSpec((tile_b, F), lambda i: (i, 0)),   # x tile (streamed)
                pl.BlockSpec((H, F), lambda i: (0, 0)),        # W1 (resident across grid)
                pl.BlockSpec((H, 1), lambda i: (0, 0)),        # b1
                pl.BlockSpec((E, H), lambda i: (0, 0)),        # W2
                pl.BlockSpec((E, 1), lambda i: (0, 0)),        # b2
                pl.BlockSpec((1, E), lambda i: (0, 0)),        # W3 (PyTorch layout)
                pl.BlockSpec((1, 1), lambda i: (0, 0)),        # b3
            ],
            out_specs=pl.BlockSpec((1, tile_b), lambda i: (0, i)),
        ),
        compiler_params=pltpu.CompilerParams(
            dimension_semantics=("parallel",)),
        cost_estimate=cost,
    )(x, w1, b1, w2, b2, w3, b3)

    # (1, B_pad) -> (B, 1); reshape is layout-only, slice drops any pad rows.
    return out_row.reshape(B_pad, 1)[:B]


def init_params(key, feature_dim, embed_dim):
    """Matches MLP._init_weights: weight ~ N(0, 0.01), bias = 0.
    Weights kept in PyTorch (out, in) layout; biases stored as column vectors."""
    k1, k2, k3 = jax.random.split(key, 3)
    hidden = embed_dim * 2
    w1 = 0.01 * jax.random.normal(k1, (hidden, feature_dim), jnp.float32)
    b1 = jnp.zeros((hidden, 1), jnp.float32)
    w2 = 0.01 * jax.random.normal(k2, (embed_dim, hidden), jnp.float32)
    b2 = jnp.zeros((embed_dim, 1), jnp.float32)
    w3 = 0.01 * jax.random.normal(k3, (1, embed_dim), jnp.float32)
    b3 = jnp.zeros((1, 1), jnp.float32)
    return (w1, b1, w2, b2, w3, b3)


if __name__ == "__main__":
    # opt.feature_dim = 32, opt.embed_dim = 16.  batch=512 keeps the demo small (64 KiB
    # of x) while the auto tile picker gives tile_b=256 -> grid=2, exercising the parallel
    # batch axis (v7x megacore sharding).  Real workloads use the 2048-row default tiles.
    feature_dim, embed_dim, batch = 32, 16, 512

    key = jax.random.PRNGKey(0)
    kx, kp = jax.random.split(key)
    x = jax.random.normal(kx, (batch, feature_dim), jnp.float32)
    params = init_params(kp, feature_dim, embed_dim)

    # Pure-JAX reference of the forward semantics (PyTorch layout: y = x @ W^T + b).
    w1, b1, w2, b2, w3, b3 = params
    ref = jax.nn.sigmoid(x @ w1.T + b1.T)
    ref = jax.nn.sigmoid(ref @ w2.T + b2.T)
    ref = ref @ w3.T + b3

    # f32 MXU-operand path (EUP approx reciprocal in the sigmoid -> slightly looser atol).
    out = mlp_forward(x, params)
    jax.block_until_ready(out)
    assert out.shape == (batch, 1)
    assert jnp.allclose(out, ref, atol=1e-3, rtol=1e-2), float(jnp.max(jnp.abs(out - ref)))

    # bf16 MXU-operand path (all generations have bf16 MXUs; bias/sigmoid stay f32).
    out_bf16 = mlp_forward(x, params, compute_dtype=jnp.bfloat16)
    jax.block_until_ready(out_bf16)
    assert out_bf16.shape == (batch, 1)
    assert jnp.allclose(out_bf16, ref, atol=5e-3, rtol=5e-2), float(
        jnp.max(jnp.abs(out_bf16 - ref)))

    print("KERNEL_OK")
</pallas_src>

<mosaic_0001>
module attributes {stable_mosaic.version = 11 : i64} {
  func.func @mlp_kernel(%arg0: i32, %arg1: memref<256x32xf32, #tpu.memory_space<vmem>>, %arg2: memref<32x32xf32, #tpu.memory_space<vmem>>, %arg3: memref<32x1xf32, #tpu.memory_space<vmem>>, %arg4: memref<16x32xf32, #tpu.memory_space<vmem>>, %arg5: memref<16x1xf32, #tpu.memory_space<vmem>>, %arg6: memref<1x16xf32, #tpu.memory_space<vmem>>, %arg7: memref<1x1xf32, #tpu.memory_space<vmem>>, %arg8: memref<1x256xf32, #tpu.memory_space<vmem>>) attributes {dimension_semantics = [#tpu.dimension_semantics<parallel>], iteration_bounds = array<i64: 2>, scalar_prefetch = 0 : i64, scratch_operands = 0 : i64, tpu.core_type = #tpu.core_type<tc>, window_params = [{transform_indices = @transform_0, window_bounds = array<i64: 256, 32>}, {pipeline_mode = #tpu.pipeline_mode<synchronous>, transform_indices = @transform_1, window_bounds = array<i64: 32, 32>}, {pipeline_mode = #tpu.pipeline_mode<synchronous>, transform_indices = @transform_2, window_bounds = array<i64: 32, 1>}, {pipeline_mode = #tpu.pipeline_mode<synchronous>, transform_indices = @transform_3, window_bounds = array<i64: 16, 32>}, {pipeline_mode = #tpu.pipeline_mode<synchronous>, transform_indices = @transform_4, window_bounds = array<i64: 16, 1>}, {pipeline_mode = #tpu.pipeline_mode<synchronous>, transform_indices = @transform_5, window_bounds = array<i64: 1, 16>}, {pipeline_mode = #tpu.pipeline_mode<synchronous>, transform_indices = @transform_6, window_bounds = array<i64: 1, 1>}, {transform_indices = @transform_7, window_bounds = array<i64: 1, 256>}]} {
    %c0 = arith.constant 0 : index
    %c0_0 = arith.constant 0 : index
    %0 = vector.load %arg1[%c0, %c0_0] : memref<256x32xf32, #tpu.memory_space<vmem>>, vector<256x32xf32>
    %c0_1 = arith.constant 0 : index
    %c0_2 = arith.constant 0 : index
    %1 = vector.load %arg2[%c0_1, %c0_2] : memref<32x32xf32, #tpu.memory_space<vmem>>, vector<32x32xf32>
    %cst = arith.constant dense<0.000000e+00> : vector<32x256xf32>
    %2 = tpu.matmul %1, %0, %cst {dimension_numbers = #tpu.dot_dimension_numbers<[1], [1], [0], [0], [0, 0, 1, 0], [], []>} : vector<32x32xf32>, vector<256x32xf32>, vector<32x256xf32> -> vector<32x256xf32>
    %c0_3 = arith.constant 0 : index
    %c0_4 = arith.constant 0 : index
    %3 = vector.load %arg3[%c0_3, %c0_4] : memref<32x1xf32, #tpu.memory_space<vmem>>, vector<32x1xf32>
    %4 = vector.broadcast %3 : vector<32x1xf32> to vector<32x256xf32>
    %5 = arith.addf %2, %4 : vector<32x256xf32>
    %cst_5 = arith.constant 0.000000e+00 : f32
    %6 = vector.broadcast %cst_5 : f32 to vector<32x256xf32>
    %7 = arith.subf %6, %5 : vector<32x256xf32>
    %8 = math.exp %7 : vector<32x256xf32>
    %cst_6 = arith.constant 1.000000e+00 : f32
    %9 = vector.broadcast %cst_6 : f32 to vector<32x256xf32>
    %10 = arith.addf %9, %8 : vector<32x256xf32>
    %11 = tpu.reciprocal %10 {approx = true} : vector<32x256xf32> -> vector<32x256xf32>
    %c0_7 = arith.constant 0 : index
    %c0_8 = arith.constant 0 : index
    %12 = vector.load %arg4[%c0_7, %c0_8] : memref<16x32xf32, #tpu.memory_space<vmem>>, vector<16x32xf32>
    %cst_9 = arith.constant dense<0.000000e+00> : vector<16x256xf32>
    %13 = tpu.matmul %12, %11, %cst_9 {dimension_numbers = #tpu.dot_dimension_numbers<[1], [0], [0], [1], [0, 0, 1, 1], [], []>} : vector<16x32xf32>, vector<32x256xf32>, vector<16x256xf32> -> vector<16x256xf32>
    %c0_10 = arith.constant 0 : index
    %c0_11 = arith.constant 0 : index
    %14 = vector.load %arg5[%c0_10, %c0_11] : memref<16x1xf32, #tpu.memory_space<vmem>>, vector<16x1xf32>
    %15 = vector.broadcast %14 : vector<16x1xf32> to vector<16x256xf32>
    %16 = arith.addf %13, %15 : vector<16x256xf32>
    %cst_12 = arith.constant 0.000000e+00 : f32
    %17 = vector.broadcast %cst_12 : f32 to vector<16x256xf32>
    %18 = arith.subf %17, %16 : vector<16x256xf32>
    %19 = math.exp %18 : vector<16x256xf32>
    %cst_13 = arith.constant 1.000000e+00 : f32
    %20 = vector.broadcast %cst_13 : f32 to vector<16x256xf32>
    %21 = arith.addf %20, %19 : vector<16x256xf32>
    %22 = tpu.reciprocal %21 {approx = true} : vector<16x256xf32> -> vector<16x256xf32>
    %c0_14 = arith.constant 0 : index
    %c0_15 = arith.constant 0 : index
    %23 = vector.load %arg6[%c0_14, %c0_15] : memref<1x16xf32, #tpu.memory_space<vmem>>, vector<1x16xf32>
    %cst_16 = arith.constant dense<0.000000e+00> : vector<1x256xf32>
    %24 = tpu.matmul %23, %22, %cst_16 {dimension_numbers = #tpu.dot_dimension_numbers<[1], [0], [0], [1], [0, 0, 1, 1], [], []>} : vector<1x16xf32>, vector<16x256xf32>, vector<1x256xf32> -> vector<1x256xf32>
    %c0_17 = arith.constant 0 : index
    %c0_18 = arith.constant 0 : index
    %25 = vector.load %arg7[%c0_17, %c0_18] : memref<1x1xf32, #tpu.memory_space<vmem>>, vector<1x1xf32>
    %26 = vector.broadcast %25 : vector<1x1xf32> to vector<1x256xf32>
    %27 = arith.addf %24, %26 : vector<1x256xf32>
    %c0_19 = arith.constant 0 : index
    %c0_20 = arith.constant 0 : index
    %28 = vector.load %arg8[%c0_19, %c0_20] : memref<1x256xf32, #tpu.memory_space<vmem>>, vector<1x256xf32>
    tpu.vector_store %arg8[%c0_19, %c0_20], %27 {strides = array<i32>} : memref<1x256xf32, #tpu.memory_space<vmem>>, vector<1x256xf32>,
    return
  }
  func.func @transform_0(%arg0: i32) -> (i32, i32) {
    %c0_i32 = arith.constant 0 : i32
    %c0_i32_0 = arith.constant 0 : i32
    return %arg0, %c0_i32 : i32, i32
  }
  func.func @transform_1(%arg0: i32) -> (i32, i32) {
    %c0_i32 = arith.constant 0 : i32
    %c0_i32_0 = arith.constant 0 : i32
    %c0_i32_1 = arith.constant 0 : i32
    return %c0_i32, %c0_i32_0 : i32, i32
  }
  func.func @transform_2(%arg0: i32) -> (i32, i32) {
    %c0_i32 = arith.constant 0 : i32
    %c0_i32_0 = arith.constant 0 : i32
    %c0_i32_1 = arith.constant 0 : i32
    return %c0_i32, %c0_i32_0 : i32, i32
  }
  func.func @transform_3(%arg0: i32) -> (i32, i32) {
    %c0_i32 = arith.constant 0 : i32
    %c0_i32_0 = arith.constant 0 : i32
    %c0_i32_1 = arith.constant 0 : i32
    return %c0_i32, %c0_i32_0 : i32, i32
  }
  func.func @transform_4(%arg0: i32) -> (i32, i32) {
    %c0_i32 = arith.constant 0 : i32
    %c0_i32_0 = arith.constant 0 : i32
    %c0_i32_1 = arith.constant 0 : i32
    return %c0_i32, %c0_i32_0 : i32, i32
  }
  func.func @transform_5(%arg0: i32) -> (i32, i32) {
    %c0_i32 = arith.constant 0 : i32
    %c0_i32_0 = arith.constant 0 : i32
    %c0_i32_1 = arith.constant 0 : i32
    return %c0_i32, %c0_i32_0 : i32, i32
  }
  func.func @transform_6(%arg0: i32) -> (i32, i32) {
    %c0_i32 = arith.constant 0 : i32
    %c0_i32_0 = arith.constant 0 : i32
    %c0_i32_1 = arith.constant 0 : i32
    return %c0_i32, %c0_i32_0 : i32, i32
  }
  func.func @transform_7(%arg0: i32) -> (i32, i32) {
    %c0_i32 = arith.constant 0 : i32
    %c0_i32_0 = arith.constant 0 : i32
    return %c0_i32, %arg0 : i32, i32
  }
}

</mosaic_0001>

<bundles_post_ra>
// kernel: tpu_custom_call.1
= control target key start
LH: loop header
LB: loop body
LE: loop exit
PB: predicated region body
PF: predicated region fallthrough
CT: control target
= control target key end

     0   :  { %s1230_s0 = inlined_call_operand.vmem [shape: f32[512,32], index: 0, kind: input, shape index: {}]   ;;  %s1231_s1 = inlined_call_operand.vmem [shape: f32[32,32], index: 1, kind: input, shape index: {}]   ;;  %s1232_s2 = inlined_call_operand.vmem [shape: f32[32,1], index: 2, kind: input, shape index: {}]   ;;  %s1233_s3 = inlined_call_operand.vmem [shape: f32[16,32], index: 3, kind: input, shape index: {}]   ;;  %s1234_s4 = inlined_call_operand.vmem [shape: f32[16,1], index: 4, kind: input, shape index: {}]   ;;  %s1235_s5 = inlined_call_operand.vmem [shape: f32[1,16], index: 5, kind: input, shape index: {}]   ;;  %s1236_s6 = inlined_call_operand.<no memory space> [shape: f32[1,1], index: 6, kind: input, shape index: {}]   ;;  %s1237_s7 = inlined_call_operand.hbm [shape: f32[1,512], index: 7, kind: output, shape index: {}]  }
   0x1   :  { %v12_v0 = vstv %s1236_s6 }
   0x2   :  { %13 = vst [vmem:[#allocation2] sm:$0x1] %v12_v0 }
   0x3   :  { %14 = vsyncpa [#allocation4], 0 }
   0x4   :  { %16 = vsyncpa [#allocation4 + $0x1], 0  ;;  %s1029_s26 = smov 0   ;;  %s1031_s27 = smov 0  }
   0x5   :  { %s1033_s28 = smov 0   ;;  %s1035_s29 = smov 0  }
   0x6 LB: > { %s1050_s6 = sadd.s32 4294967295, %s983_s29   ;;  %s773_s30 = sadd.s32 4294967294, %s983_s29   ;;  %s983_s29 = sphi %s1035_s29, %s1243_s29   ;;  %s979_s28 = sphi %s1033_s28, %s1242_s28   ;;  %s975_s27 = sphi %s1031_s27, %s1241_s27   ;;  %s971_s26 = sphi %s1029_s26, %s1240_s26  }
   0x7   : > { %s1054_s8 = sadd.s32 1, %s983_s29   ;;  %s181_s9 = sadd.s32 1, %s979_s28 }
   0x8   : > { %s178_s10 = ssub.s32 %s983_s29, %s1054_s8  ;;  %p191_p0 = scmp.ne.s32.totalorder %s979_s28, %s975_s27 }
   0x9   : > { %p179_p1 = scmp.eq.s32.totalorder %s178_s10, 0  ;;  %p192_p2 = scmp.eq.s32.totalorder %s1050_s6, 1 }
   0xa   : > { %p197_p3 = scmp.ne.s32.totalorder %s975_s27, %s971_s26  ;;  %p198_p4 = scmp.eq.s32.totalorder %s773_s30, 1 }
   0xb   : > { %s1065_s11 = scalar_select %p179_p1, %s979_s28, %s181_s9  }
   0xc   : > { %p1067_p5 = por %p192_p2, %p191_p0  ;;  %p1071_p6 = por %p198_p4, %p197_p3 }
   0xd   : > { %p776_p7 = scmp.ge.s32.totalorder %s983_s29, 1  ;;  %p243_p8 = scmp.lt.s32.totalorder %s983_s29, 3 }
   0xf   : > { %p244_p9 = pnand %p776_p7, %p243_p8 }
  0x10   : > { %s778_s14 = sshll.u32 (!%p244_p9), %s1050_s6, 5  ;;  %s827_s17 = sshll.u32 (!%p244_p9), %s1050_s6, 1 }
  0x11   : > { %247 = sbr.rel (%p244_p9) target bundleno = 575 (0x23f), region = 48  ;;  %p276_p10 = scmp.lt.s32.totalorder (!%p244_p9), %s778_s14, 63 }
  0x12   : > { %s709_s20 = scalar_lea.hbm (!%p244_p9), %s1237_s7, %s827_s17  ;;  %s941_s10 = scalar_lea.hbm (!%p244_p9), %s1237_s7, 4 }
  0x13   : > { %s713_s23 = sshll.u32 (!%p244_p9), %s709_s20, 4  ;;  %s714_s23 = int_to_ptr.hbm [resolvable:$true] %s713_s23 }
  0x14   : > { %s935_s24 = sshra.s32 (!%p244_p9), %s714_s23, 4  ;;  %s936_s24 = int_to_ptr.hbm [resolvable:$true] %s935_s24 }
  0x15   : > { %s937_s25 = scalar_lea.hbm (!%p244_p9), %s936_s24, 2  ;;  %p942_p0 = scmp.lt.s32.totalorder (!%p244_p9), %s936_s24, %s1237_s7 }
  0x16   : > { %s1245_s14 = smov (!%p276_p10, %s778_s14), 63  ;;  %vm342_vm0 = vcmask 261120   ;;  %v319_v19 = vld [vmem:[%s1232_s2 + $0x8] sm:$0xff]  ;;  %v985_v22 = vmov 0   ;;  %v318_v25 = vld [vmem:[%s1232_s2] sm:$0xff]  ;;  %v321_v26 = vld [vmem:[%s1232_s2 + $0x18] sm:$0xff]  ;;  %p938_p11 = scmp.ne.s32.totalorder %s936_s24, %s937_s25 }
  0x17   : > { %s779_s15 = sshll.u32 %s1245_s14, 3  ;;  %871 = vset.pattern.permute.xlu1 %v985_v22  ;;  %870 = vset.pattern.permute.xlu0 %v985_v22  ;;  %v320_v31 = vld [vmem:[%s1232_s2 + $0x10] sm:$0xff]  ;;  %v636_v36 = vld [vmem:[#allocation2] sm:$0x1]  ;;  %v315_v40 = vld [vmem:[%s1231_s1 + $0x8] sm:$0xff]  ;;  %vm643_vm1 = vcmask 130048   ;;  %p943_p1 = scmp.lt.s32.totalorder %s941_s10, %s937_s25 }
  0x18   : > { %s1081_s18 = scalar_lea.vmem %s1230_s0, %s779_s15  ;;  %329 = vperm.xlu1 %871, %v319_v19   ;;  %872 = vset.pattern.permute.xlu2 %v985_v22  ;;  %v314_v39 = vld [vmem:[%s1231_s1] sm:$0xff]  ;;  %v316_v41 = vld [vmem:[%s1231_s1 + $0x10] sm:$0xff]  ;;  %v317_v42 = vld [vmem:[%s1231_s1 + $0x18] sm:$0xff]  ;;  %s272_s15 = sand.u32 1, %s975_s27   ;;  %vm690_vm2 = vcmask 1040384  }
  0x19   : > { %v297_v1 = vld [vmem:[%s1081_s18 + $0x78] sm:$0xff]  ;;  %v296_v3 = vld [vmem:[%s1081_s18 + $0x70] sm:$0xff]  ;;  %v295_v5 = vld [vmem:[%s1081_s18 + $0x68] sm:$0xff]  ;;  %339 = vperm.xlu0 %870, %v321_v26   ;;  %s777_s16 = sshll.u32 %s272_s15, 1  ;;  %s699_s6 = scalar_lea.sflag [#allocation4], %s272_s15 }
  0x1a   : > { %v313_v2 = vld [vmem:[%s1081_s18 + $0xf8] sm:$0xff]  ;;  %780 = vmatpush.xpose.msk.msra.mxu0 %vm342_vm0, %v297_v1  ;;  %v312_v4 = vld [vmem:[%s1081_s18 + $0xf0] sm:$0xff]  ;;  %v311_v6 = vld [vmem:[%s1081_s18 + $0xe8] sm:$0xff]  ;;  %s274_s21 = scalar_lea.vmem [#allocation3], %s777_s16  ;;  %p939_p12 = pnand %p938_p11, %p1067_p5 }
  0x1b   : > { %800 = vmatpush.xpose.msk.msra.mxu1 %vm342_vm0, %v313_v2  ;;  %v294_v7 = vld [vmem:[%s1081_s18 + $0x60] sm:$0xff]  ;;  %v293_v9 = vld [vmem:[%s1081_s18 + $0x58] sm:$0xff]  ;;  %v292_v11 = vld [vmem:[%s1081_s18 + $0x50] sm:$0xff]  ;;  %s711_s22 = sshll.u32 %s274_s21, 4  ;;  %p944_p2 = por %p943_p1, %p942_p0  ;;  %s712_s22 = int_to_ptr.vmem [resolvable:$true] %s711_s22 }
  0x1c   : > { %v310_v8 = vld [vmem:[%s1081_s18 + $0xe0] sm:$0xff]  ;;  %v309_v10 = vld [vmem:[%s1081_s18 + $0xd8] sm:$0xff]  ;;  %v308_v12 = vld [vmem:[%s1081_s18 + $0xd0] sm:$0xff]  ;;  %p940_p13 = pneg %p939_p12 }
  0x1d   : > { %v291_v13 = vld [vmem:[%s1081_s18 + $0x48] sm:$0xff]  ;;  %v290_v15 = vld [vmem:[%s1081_s18 + $0x40] sm:$0xff]  ;;  %v289_v17 = vld [vmem:[%s1081_s18 + $0x38] sm:$0xff] }
  0x1e   : > { %781 = vmatpush.xpose.msk.msra.mxu0 %vm342_vm0, %v296_v3  ;;  %v307_v14 = vld [vmem:[%s1081_s18 + $0xc8] sm:$0xff]  ;;  %v306_v16 = vld [vmem:[%s1081_s18 + $0xc0] sm:$0xff]  ;;  %v305_v18 = vld [vmem:[%s1081_s18 + $0xb8] sm:$0xff]  ;;  %p945_p3 = pnand %p944_p2, %p940_p13 }
  0x1f   : > { %801 = vmatpush.xpose.msk.msra.mxu1 %vm342_vm0, %v312_v4  ;;  %v288_v20 = vld [vmem:[%s1081_s18 + $0x30] sm:$0xff]  ;;  %v287_v23 = vld [vmem:[%s1081_s18 + $0x28] sm:$0xff]  ;;  %v286_v27 = vld [vmem:[%s1081_s18 + $0x20] sm:$0xff] }
  0x20   : > { %v304_v21 = vld [vmem:[%s1081_s18 + $0xb0] sm:$0xff]  ;;  %v303_v24 = vld [vmem:[%s1081_s18 + $0xa8] sm:$0xff]  ;;  %v302_v28 = vld [vmem:[%s1081_s18 + $0xa0] sm:$0xff]  ;;  %324 = vperm.xlu1 %871, %v318_v25  }
  0x21   : > { %v285_v29 = vld [vmem:[%s1081_s18 + $0x18] sm:$0xff]  ;;  %v284_v32 = vld [vmem:[%s1081_s18 + $0x10] sm:$0xff]  ;;  %334 = vperm.xlu0 %870, %v320_v31   ;;  %v283_v34 = vld [vmem:[%s1081_s18 + $0x8] sm:$0xff] }
  0x22   : > { %782 = vmatpush.xpose.msk.msra.mxu0 %vm342_vm0, %v295_v5  ;;  %v301_v30 = vld [vmem:[%s1081_s18 + $0x98] sm:$0xff]  ;;  %v300_v33 = vld [vmem:[%s1081_s18 + $0x90] sm:$0xff]  ;;  %v299_v35 = vld [vmem:[%s1081_s18 + $0x88] sm:$0xff] }
  0x23   : > { %802 = vmatpush.xpose.msk.msra.mxu1 %vm342_vm0, %v311_v6  ;;  %v282_v37 = vld [vmem:[%s1081_s18] sm:$0xff] }
  0x24   : > { %v298_v38 = vld [vmem:[%s1081_s18 + $0x80] sm:$0xff] }
  0x26   : > { %783 = vmatpush.xpose.msk.msra.mxu0 %vm342_vm0, %v294_v7 }
  0x27   : > { %803 = vmatpush.xpose.msk.msra.mxu1 %vm342_vm0, %v310_v8 }
  0x29   : > { %639 = vperm.xlu0 %870, %v636_v36  }
  0x2a   : > { %784 = vmatpush.xpose.msk.msra.mxu0 %vm342_vm0, %v293_v9 }
  0x2b   : > { %804 = vmatpush.xpose.msk.msra.mxu1 %vm342_vm0, %v309_v10 }
  0x2e   : > { %785 = vmatpush.xpose.msk.msra.mxu0 %vm342_vm0, %v292_v11 }
  0x2f   : > { %805 = vmatpush.xpose.msk.msra.mxu1 %vm342_vm0, %v308_v12 }
  0x32   : > { %786 = vmatpush.xpose.msk.msra.mxu0 %vm342_vm0, %v291_v13 }
  0x33   : > { %806 = vmatpush.xpose.msk.msra.mxu1 %vm342_vm0, %v307_v14 }
  0x36   : > { %787 = vmatpush.xpose.msk.msra.mxu0 %vm342_vm0, %v290_v15  ;;  %v552_v15 = vld [vmem:[%s1234_s4 + $0x8] sm:$0xff] }
  0x37   : > { %807 = vmatpush.xpose.msk.msra.mxu1 %vm342_vm0, %v306_v16  ;;  %560 = vperm.xlu2 %872, %v552_v15  }
  0x3a   : > { %788 = vmatpush.xpose.msk.msra.mxu0 %vm342_vm0, %v289_v17 }
  0x3b   : > { %808 = vmatpush.xpose.msk.msra.mxu1 %vm342_vm0, %v305_v18 }
  0x3e   : > { %789 = vmatpush.xpose.msk.msra.mxu0 %vm342_vm0, %v288_v20 }
  0x3f   : > { %809 = vmatpush.xpose.msk.msra.mxu1 %vm342_vm0, %v304_v21 }
  0x42   : > { %790 = vmatpush.xpose.msk.msra.mxu0 %vm342_vm0, %v287_v23 }
  0x43   : > { %810 = vmatpush.xpose.msk.msra.mxu1 %vm342_vm0, %v303_v24  ;;  %v551_v24 = vld [vmem:[%s1234_s4] sm:$0xff] }
  0x44   : > { %555 = vperm.xlu2 %872, %v551_v24  }
  0x46   : > { %791 = vmatpush.xpose.msk.msra.mxu0 %vm342_vm0, %v286_v27 }
  0x47   : > { %811 = vmatpush.xpose.msk.msra.mxu1 %vm342_vm0, %v302_v28 }
  0x4a   : > { %792 = vmatpush.xpose.msk.msra.mxu0 %vm342_vm0, %v285_v29 }
  0x4b   : > { %812 = vmatpush.xpose.msk.msra.mxu1 %vm342_vm0, %v301_v30 }
  0x4e   : > { %793 = vmatpush.xpose.msk.msra.mxu0 %vm342_vm0, %v284_v32 }
  0x4f   : > { %813 = vmatpush.xpose.msk.msra.mxu1 %vm342_vm0, %v300_v33 }
  0x52   : > { %794 = vmatpush.xpose.msk.msra.mxu0 %vm342_vm0, %v283_v34 }
  0x53   : > { %814 = vmatpush.xpose.msk.msra.mxu1 %vm342_vm0, %v299_v35 }
  0x56   : > { %795 = vmatpush.xpose.msk.msra.mxu0 %vm342_vm0, %v282_v37 }
  0x57   : > { %815 = vmatpush.xpose.msk.msra.mxu1 %vm342_vm0, %v298_v38 }
  0x59   : > { %796 = vmatmul.msk.f32.vlgmr.msra.gmra.mxu0 %vm342_vm0, %v314_v39 }
  0x5a   : > { %816 = vmatmul.msk.f32.vlgmr.msra.gmra.mxu1 %vm342_vm0, %v314_v39  ;;  %v549_v39 = vld [vmem:[%s1233_s3] sm:$0xff] }
  0x61   : > { %797 = vmatmul.msk.f32.gmra.mxu0 %vm342_vm0, %v315_v40 }
  0x62   : > { %817 = vmatmul.msk.f32.gmra.mxu1 %vm342_vm0, %v315_v40 }
  0x69   : > { %798 = vmatmul.msk.f32.gmra.mxu0 %vm342_vm0, %v316_v41 }
  0x6a   : > { %818 = vmatmul.msk.f32.gmra.mxu1 %vm342_vm0, %v316_v41 }
  0x71   : > { %799 = vmatmul.msk.f32.gmra.mxu0 %vm342_vm0, %v317_v42 }
  0x72   : > { %819 = vmatmul.msk.f32.gmra.mxu1 %vm342_vm0, %v317_v42  ;;  %v550_v42 = vld [vmem:[%s1233_s3 + $0x8] sm:$0xff] }
  0x8a   : > { %v330_v45 = vpop.permute.xlu1 %329 }
  0x8b   : > { %v340_v46 = vpop.permute.xlu0 %339 }
  0x92   : > { %v325_v49 = vpop.permute.xlu1 %324 }
  0x93   : > { %v335_v51 = vpop.permute.xlu0 %334 }
  0xd6   : > { %v468_v43 = vpop.f32.mrf.mxu0 }
  0xd7   : > { %v497_v44 = vpop.f32.mrf.mxu1  ;;  %v469_v50 = vadd.f32 %v468_v43, %v325_v49  ;;  %v561_v43 = vpop.permute.xlu2 %560 }
  0xd8   : > { %v498_v63 = vadd.f32 %v497_v44, %v325_v49 }
  0xd9   : > { %v509_v57 = vsub.f32 0.0, %v469_v50 }
  0xda   : > { %v510_v8 = vsub.f32 0.0, %v498_v63 }
  0xdb   : > { %v517_v62 = vmul.f32 1.442695, %v509_v57 }
  0xdc   : > { %v519_v14 = vmul.f32 1.442695, %v510_v8 }
  0xdd   : > { %873 = vpow2.f32 %v517_v62 }
  0xde   : > { %v471_v47 = vpop.f32.mrf.mxu0 }
  0xdf   : > { %v500_v48 = vpop.f32.mrf.mxu1  ;;  %v472_v54 = vadd.f32 %v471_v47, %v330_v45  ;;  %v556_v44 = vpop.permute.xlu2 %555 }
  0xe0   : > { %v501_v58 = vadd.f32 %v500_v48, %v330_v45 }
  0xe1   : > { %v511_v60 = vsub.f32 0.0, %v472_v54 }
  0xe2   : > { %v512_v0 = vsub.f32 0.0, %v501_v58 }
  0xe3   : > { %v521_v4 = vmul.f32 1.442695, %v511_v60  ;;  %v874_v16 = vpop.eup %873 }
  0xe4   : > { %v523_v11 = vmul.f32 1.442695, %v512_v0  ;;  %v533_v30 = vadd.f32 1.0, %v874_v16 }
  0xe6   : > { %v474_v52 = vpop.f32.mrf.mxu0 }
  0xe7   : > { %v503_v53 = vpop.f32.mrf.mxu1  ;;  %v475_v55 = vadd.f32 %v474_v52, %v335_v51 }
  0xe8   : > { %v504_v56 = vadd.f32 %v503_v53, %v335_v51 }
  0xe9   : > { %v513_v59 = vsub.f32 0.0, %v475_v55 }
  0xea   : > { %v514_v61 = vsub.f32 0.0, %v504_v56 }
  0xeb   : > { %v525_v1 = vmul.f32 1.442695, %v513_v59 }
  0xec   : > { %v527_v7 = vmul.f32 1.442695, %v514_v61 }
  0xed   : > { %875 = vpow2.f32 %v525_v1 }
  0xee   : > { %v477_v2 = vpop.f32.mrf.mxu0  ;;  %877 = vpow2.f32 %v521_v4 }
  0xef   : > { %v506_v3 = vpop.f32.mrf.mxu1  ;;  %v478_v5 = vadd.f32 %v477_v2, %v340_v46  ;;  %879 = vpow2.f32 %v527_v7  ;;  %v635_v7 = vld [vmem:[%s1235_s5] sm:$0x1] }
  0xf0   : > { %v507_v6 = vadd.f32 %v506_v3, %v340_v46 }
  0xf1   : > { %v515_v9 = vsub.f32 0.0, %v478_v5 }
  0xf2   : > { %v516_v10 = vsub.f32 0.0, %v507_v6 }
  0xf3   : > { %v529_v12 = vmul.f32 1.442695, %v515_v9  ;;  %v876_v17 = vpop.eup %875 }
  0xf4   : > { %v531_v13 = vmul.f32 1.442695, %v516_v10  ;;  %v878_v18 = vpop.eup %877  ;;  %v537_v21 = vadd.f32 1.0, %v876_v17  ;;  %v640_v10 = vpop.permute.xlu0 %639 }
  0xf5   : > { %881 = vpow2.f32 %v529_v12  ;;  %v880_v19 = vpop.eup %879  ;;  %v535_v26 = vadd.f32 1.0, %v878_v18  ;;  %v693_v12 = vlaneseq }
  0xf6   : > { %883 = vpow2.f32 %v523_v11  ;;  %v538_v27 = vadd.f32 1.0, %v880_v19  ;;  %v642_v11 = vperm.slane %v640_v10, 0 }
  0xf7   : > { %885 = vpow2.f32 %v531_v13  ;;  %vm695_vm3 = vcmp.lt.s32.totalorder %v693_v12, 256 }
  0xf8   : > { %887 = vpow2.f32 %v519_v14 }
  0xfb   : > { %v882_v20 = vpop.eup %881 }
  0xfc   : > { %v884_v22 = vpop.eup %883  ;;  %v539_v23 = vadd.f32 1.0, %v882_v20 }
  0xfd   : > { %v886_v25 = vpop.eup %885  ;;  %v536_v31 = vadd.f32 1.0, %v884_v22 }
  0xfe   : > { %889 = vrcp.f32 %v539_v23  ;;  %v540_v28 = vadd.f32 1.0, %v886_v25  ;;  %v888_v29 = vpop.eup %887 }
  0xff   : > { %891 = vrcp.f32 %v537_v21  ;;  %v534_v32 = vadd.f32 1.0, %v888_v29 }
 0x100   : > { %893 = vrcp.f32 %v540_v28 }
 0x101   : > { %895 = vrcp.f32 %v535_v26 }
 0x102   : > { %897 = vrcp.f32 %v538_v27 }
 0x103   : > { %899 = vrcp.f32 %v533_v30 }
 0x104   : > { %v890_v33 = vpop.eup %889  ;;  %901 = vrcp.f32 %v536_v31 }
 0x105   : > { %v892_v34 = vpop.eup %891  ;;  %581 = vmatpush.msra.mxu2 %v890_v33  ;;  %903 = vrcp.f32 %v534_v32 }
 0x106   : > { %v894_v35 = vpop.eup %893 }
 0x107   : > { %v896_v36 = vpop.eup %895  ;;  %604 = vmatpush.msra.mxu3 %v894_v35  ;;  %582 = vmatpush.msra.mxu2 %v892_v34 }
 0x108   : > { %v898_v37 = vpop.eup %897 }
 0x109   : > { %v900_v38 = vpop.eup %899  ;;  %605 = vmatpush.msra.mxu3 %v898_v37  ;;  %583 = vmatpush.msra.mxu2 %v896_v36 }
 0x10a   : > { %v902_v40 = vpop.eup %901 }
 0x10b   : > { %606 = vmatpush.msra.mxu3 %v902_v40  ;;  %584 = vmatpush.msra.mxu2 %v900_v38  ;;  %v904_v41 = vpop.eup %903 }
 0x10c   : > { %820 = vmatmul.msk.f32.vlgmr.msra.gmra.mxu2 %vm342_vm0, %v549_v39 }
 0x10d   : > { %607 = vmatpush.msra.mxu3 %v904_v41 }
 0x10e   : > { %822 = vmatmul.msk.f32.vlgmr.msra.gmra.mxu3 %vm342_vm0, %v549_v39 }
 0x114   : > { %821 = vmatmul.msk.f32.gmra.mxu2 %vm342_vm0, %v550_v42 }
 0x116   : > { %823 = vmatmul.msk.f32.gmra.mxu3 %vm342_vm0, %v550_v42 }
 0x18f   : > { %v586_v45 = vpop.f32.mrf.mxu2 }
 0x190   : > { %v587_v46 = vadd.f32 %v586_v45, %v556_v44 }
 0x191   : > { %v609_v47 = vpop.f32.mrf.mxu3 }
 0x192   : > { %v610_v48 = vadd.f32 %v609_v47, %v556_v44  ;;  %v615_v49 = vsub.f32 0.0, %v587_v46 }
 0x194   : > { %v616_v50 = vsub.f32 0.0, %v610_v48  ;;  %v619_v51 = vmul.f32 1.442695, %v615_v49 }
 0x196   : > { %v621_v54 = vmul.f32 1.442695, %v616_v50  ;;  %905 = vpow2.f32 %v619_v51 }
 0x197   : > { %v589_v52 = vpop.f32.mrf.mxu2 }
 0x198   : > { %v590_v53 = vadd.f32 %v589_v52, %v561_v43  ;;  %907 = vpow2.f32 %v621_v54 }
 0x199   : > { %v612_v55 = vpop.f32.mrf.mxu3 }
 0x19a   : > { %v617_v56 = vsub.f32 0.0, %v590_v53  ;;  %v613_v57 = vadd.f32 %v612_v55, %v561_v43 }
 0x19c   : > { %v623_v58 = vmul.f32 1.442695, %v617_v56  ;;  %v618_v59 = vsub.f32 0.0, %v613_v57  ;;  %v906_v61 = vpop.eup %905 }
 0x19d   : > { %v627_v0 = vadd.f32 1.0, %v906_v61 }
 0x19e   : > { %909 = vpow2.f32 %v623_v58  ;;  %v625_v60 = vmul.f32 1.442695, %v618_v59  ;;  %v908_v62 = vpop.eup %907 }
 0x19f   : > { %v628_v3 = vadd.f32 1.0, %v908_v62 }
 0x1a0   : > { %911 = vpow2.f32 %v625_v60 }
 0x1a4   : > { %v910_v63 = vpop.eup %909 }
 0x1a5   : > { %v629_v1 = vadd.f32 1.0, %v910_v63 }
 0x1a6   : > { %v912_v2 = vpop.eup %911 }
 0x1a7   : > { %913 = vrcp.f32 %v629_v1  ;;  %v630_v4 = vadd.f32 1.0, %v912_v2 }
 0x1a8   : > { %915 = vrcp.f32 %v627_v0 }
 0x1a9   : > { %917 = vrcp.f32 %v630_v4 }
 0x1aa   : > { %919 = vrcp.f32 %v628_v3 }
 0x1ad   : > { %v914_v5 = vpop.eup %913 }
 0x1ae   : > { %v916_v6 = vpop.eup %915  ;;  %661 = vmatpush.msrb.mxu2 %v914_v5 }
 0x1af   : > { %v918_v8 = vpop.eup %917 }
 0x1b0   : > { %681 = vmatpush.msrb.mxu3 %v918_v8  ;;  %662 = vmatpush.msrb.mxu2 %v916_v6  ;;  %v920_v9 = vpop.eup %919 }
 0x1b1   : > { %824 = vmatmul.msk.f32.vlgmr.msrb.gmra.mxu2 %vm643_vm1, %v635_v7 }
 0x1b2   : > { %682 = vmatpush.msrb.mxu3 %v920_v9 }
 0x1b3   : > { %825 = vmatmul.msk.f32.vlgmr.msrb.gmra.mxu3 %vm643_vm1, %v635_v7 }
 0x234   : > { %v664_v13 = vpop.f32.mrf.mxu2 }
 0x235   : > { %v665_v16 = vadd.f32 %v664_v13, %v642_v11 }
 0x236   : > { %v684_v14 = vpop.f32.mrf.mxu3 }
 0x237   : > { %v685_v15 = vadd.f32 %v684_v14, %v642_v11 }
 0x239   : > { %v689_v17 = vrot.slane %v685_v15, 7 }
 0x23b   : > { %v691_v18 = vsel %vm690_vm2, %v665_v16, %v689_v17 }
 0x23c   : > { %697 = vst.msk [vmem:[%s274_s21] sm:$0x3] %vm695_vm3, %v691_v18 }
 0x23d   : > { %948 = shalt.err (!%p945_p3)
}
 0x23e   : > { %830 = dma.vmem_to_hbm [thread:$0]  (%p1067_p5), %s712_s22, 32, %s714_s23, %s699_s6  }
 0x23f PF: > { %p836_p4 = scmp.ge.s32.totalorder %s983_s29, 2  ;;  %s725_s15 = sand.u32 1, %s971_s26  }
 0x240   : > { %s726_s17 = scalar_lea.sflag [#allocation4], %s725_s15 }
 0x241   : > { %p833_p7 = pnand %p836_p4, %p1071_p6 }
 0x243   : > { %p834_p8 = pneg %p833_p7 }
 0x245   : > { %966 = dma.done.wait (%p834_p8), %s726_s17, 32  }
 0x246   : > { %968 = vsyncadd (%p834_p8), %s726_s17, 4294967264  ;;  %p19_p9 = scmp.ge.s32.totalorder %s1054_s8, 4   ;;  %s1240_s26 = smov %s975_s27 }
 0x247   : > { %s1241_s27 = smov %s979_s28  ;;  %s1242_s28 = smov %s1065_s11 }
 0x248   : > { %s1243_s29 = smov %s1054_s8  ;;  %21 = sbr.rel (!%p19_p9) target bundleno = 6 (0x6), region = 83 }
 0x24d   :  { %732 = vsyncpa [#allocation4], 1 }
 0x24e   :  { %734 = vsyncpa [#allocation4 + $0x1], 1 }

</bundles_post_ra>
